<compile_context>
chip_gen: v7x
topology: tpu7x:2x2x1
jax: 0.10.0
libtpu: 0.0.40
codegen_flags: <defaults>
</compile_context>

<pallas_src>
import jax
import jax.numpy as jnp
from jax.experimental import pallas as pl
from jax.experimental.pallas import tpu as pltpu


def _round_up(n: int, m: int) -> int:
    return ((n + m - 1) // m) * m


def _linear_relu_kernel(x_ref, w_ref, b_ref, o_ref, acc_ref):
    """One (i, j, k) grid step of ReLU(x @ w + b).

    x_ref: (tm, tk) bf16    w_ref: (tk, tn) bf16    b_ref: (1, tn) f32
    o_ref: (tm, tn)         acc_ref: (tm, tn) f32 scratch, resident over k.
    """
    k = pl.program_id(2)

    @pl.when(k == 0)
    def _init():
        acc_ref[...] = jnp.zeros_like(acc_ref)

    # MXU: bf16 x bf16 -> f32 accumulation.
    acc_ref[...] += jnp.dot(
        x_ref[...], w_ref[...], preferred_element_type=jnp.float32
    )

    @pl.when(k == pl.num_programs(2) - 1)
    def _finalize():
        # Bias + ReLU epilogue in f32 (one-time, in otherwise-free VALU slack).
        out = acc_ref[...] + b_ref[...]
        o_ref[...] = jnp.maximum(out, 0.0).astype(o_ref.dtype)


def _tiled_linear_relu(x, w, b, *, tm, tn, tk, out_dtype):
    M, K = x.shape
    N = w.shape[1]
    grid = (M // tm, N // tn, K // tk)
    return pl.pallas_call(
        _linear_relu_kernel,
        out_shape=jax.ShapeDtypeStruct((M, N), out_dtype),
        grid=grid,
        in_specs=[
            pl.BlockSpec((tm, tk), lambda i, j, k: (i, k)),
            pl.BlockSpec((tk, tn), lambda i, j, k: (k, j)),
            pl.BlockSpec((1, tn), lambda i, j, k: (0, j)),
        ],
        out_specs=pl.BlockSpec((tm, tn), lambda i, j, k: (i, j)),
        scratch_shapes=[pltpu.VMEM((tm, tn), jnp.float32)],
        compiler_params=pltpu.CompilerParams(
            dimension_semantics=("parallel", "parallel", "arbitrary"),
            vmem_limit_bytes=32 * 1024 * 1024,
        ),
    )(x, w, b)


@jax.jit
def linear_relu(x, w, b):
    """ReLU(x @ w + b): pad to MXU/lane-friendly shapes, run the tiled Pallas
    kernel with bf16 operands + f32 accumulation, slice back to caller shape."""
    M, K = x.shape
    N = w.shape[1]

    # Tile sizes (v7x-safe: <=256x256 output tile, <=512 K tile, bf16 inputs).
    tm = min(256, _round_up(M, 8))
    tn = min(256, _round_up(N, 128))
    tk = min(512, _round_up(K, 128))

    Mp, Np, Kp = _round_up(M, tm), _round_up(N, tn), _round_up(K, tk)

    xb = jnp.pad(x, ((0, Mp - M), (0, Kp - K))).astype(jnp.bfloat16)
    wb = jnp.pad(w, ((0, Kp - K), (0, Np - N))).astype(jnp.bfloat16)
    bb = jnp.pad(b, ((0, 0), (0, Np - N))).astype(jnp.float32)

    out = _tiled_linear_relu(xb, wb, bb, tm=tm, tn=tn, tk=tk, out_dtype=x.dtype)
    return out[:M, :N]


class InnerModel:
    """Deterministic synthetic inner model: Linear(hidden, hidden) + ReLU."""

    def __init__(self, hidden: int, key):
        kw, kb = jax.random.split(key)
        bound = 1.0 / (hidden ** 0.5)
        self.w = jax.random.uniform(
            kw, (hidden, hidden), jnp.float32, -bound, bound
        )
        self.b = jax.random.uniform(
            kb, (1, hidden), jnp.float32, -bound, bound
        )

    def __call__(self, x):
        return linear_relu(x, self.w, self.b)


class DummyModule:
    """JAX equivalent of nnet/py_factory.py:DummyModule — pure pass-through."""

    def __init__(self, model):
        self.module = model

    def __call__(self, *xs, **kwargs):
        # Exact forward semantics: delegate everything to the wrapped module.
        return self.module(*xs, **kwargs)


if __name__ == "__main__":
    key = jax.random.PRNGKey(0)
    k_param, k_x = jax.random.split(key)

    seq, hidden = 8, 32
    inner = InnerModel(hidden, k_param)
    net = DummyModule(inner)

    x = jax.random.normal(k_x, (seq, hidden), jnp.float32)

    out = net(x)
    out = jax.block_until_ready(out)

    # Reference uses the same bf16-cast operands with f32 accumulation so the
    # comparison against the MXU result is tight.
    xb = x.astype(jnp.bfloat16).astype(jnp.float32)
    wb = inner.w.astype(jnp.bfloat16).astype(jnp.float32)
    ref = jnp.maximum(xb @ wb + inner.b, 0.0)

    assert out.shape == (seq, hidden)
    assert out.dtype == x.dtype
    assert jnp.allclose(out, ref, atol=1e-3, rtol=1e-3)

    print("KERNEL_OK")
</pallas_src>

<mosaic_0001>
module attributes {stable_mosaic.version = 11 : i64} {
  func.func @_linear_relu_kernel(%arg0: i32, %arg1: i32, %arg2: i32, %arg3: memref<8x128xbf16, #tpu.memory_space<vmem>>, %arg4: memref<128x128xbf16, #tpu.memory_space<vmem>>, %arg5: memref<1x128xf32, #tpu.memory_space<vmem>>, %arg6: memref<8x128xf32, #tpu.memory_space<vmem>>, %arg7: memref<8x128xf32, #tpu.memory_space<vmem>>) attributes {dimension_semantics = [#tpu.dimension_semantics<parallel>, #tpu.dimension_semantics<parallel>, #tpu.dimension_semantics<arbitrary>], iteration_bounds = array<i64: 1, 1, 1>, scalar_prefetch = 0 : i64, scratch_operands = 1 : i64, tpu.core_type = #tpu.core_type<tc>, window_params = [{transform_indices = @transform_0, window_bounds = array<i64: 8, 128>}, {transform_indices = @transform_1, window_bounds = array<i64: 128, 128>}, {transform_indices = @transform_2, window_bounds = array<i64: 1, 128>}, {transform_indices = @transform_3, window_bounds = array<i64: 8, 128>}]} {
    %c0_i32 = arith.constant 0 : i32
    %0 = arith.cmpi eq, %arg2, %c0_i32 : i32
    %1 = arith.extui %0 : i1 to i32
    %c0_i32_0 = arith.constant 0 : i32
    %2 = arith.cmpi ne, %1, %c0_i32_0 : i32
    scf.if %2 {
      %cst_10 = arith.constant 0.000000e+00 : f32
      %12 = vector.broadcast %cst_10 : f32 to vector<8x128xf32>
      %c0_11 = arith.constant 0 : index
      %c0_12 = arith.constant 0 : index
      %13 = vector.load %arg7[%c0_11, %c0_12] : memref<8x128xf32, #tpu.memory_space<vmem>>, vector<8x128xf32>
      tpu.vector_store %arg7[%c0_11, %c0_12], %12 {strides = array<i32>} : memref<8x128xf32, #tpu.memory_space<vmem>>, vector<8x128xf32>,
    } else {
    }
    %c0 = arith.constant 0 : index
    %c0_1 = arith.constant 0 : index
    %3 = vector.load %arg7[%c0, %c0_1] : memref<8x128xf32, #tpu.memory_space<vmem>>, vector<8x128xf32>
    %c0_2 = arith.constant 0 : index
    %c0_3 = arith.constant 0 : index
    %4 = vector.load %arg3[%c0_2, %c0_3] : memref<8x128xbf16, #tpu.memory_space<vmem>>, vector<8x128xbf16>
    %c0_4 = arith.constant 0 : index
    %c0_5 = arith.constant 0 : index
    %5 = vector.load %arg4[%c0_4, %c0_5] : memref<128x128xbf16, #tpu.memory_space<vmem>>, vector<128x128xbf16>
    %cst = arith.constant dense<0.000000e+00> : vector<8x128xf32>
    %6 = tpu.matmul %4, %5, %cst {dimension_numbers = #tpu.dot_dimension_numbers<[1], [0], [0], [1], [0, 0, 1, 1], [], []>} : vector<8x128xbf16>, vector<128x128xbf16>, vector<8x128xf32> -> vector<8x128xf32>
    %7 = arith.addf %3, %6 : vector<8x128xf32>
    %c0_6 = arith.constant 0 : index
    %c0_7 = arith.constant 0 : index
    %8 = vector.load %arg7[%c0_6, %c0_7] : memref<8x128xf32, #tpu.memory_space<vmem>>, vector<8x128xf32>
    tpu.vector_store %arg7[%c0_6, %c0_7], %7 {strides = array<i32>} : memref<8x128xf32, #tpu.memory_space<vmem>>, vector<8x128xf32>,
    %c0_i32_8 = arith.constant 0 : i32
    %9 = arith.cmpi eq, %arg2, %c0_i32_8 : i32
    %10 = arith.extui %9 : i1 to i32
    %c0_i32_9 = arith.constant 0 : i32
    %11 = arith.cmpi ne, %10, %c0_i32_9 : i32
    scf.if %11 {
      %c0_10 = arith.constant 0 : index
      %c0_11 = arith.constant 0 : index
      %12 = vector.load %arg7[%c0_10, %c0_11] : memref<8x128xf32, #tpu.memory_space<vmem>>, vector<8x128xf32>
      %c0_12 = arith.constant 0 : index
      %c0_13 = arith.constant 0 : index
      %13 = vector.load %arg5[%c0_12, %c0_13] : memref<1x128xf32, #tpu.memory_space<vmem>>, vector<1x128xf32>
      %14 = vector.broadcast %13 : vector<1x128xf32> to vector<8x128xf32>
      %15 = arith.addf %12, %14 : vector<8x128xf32>
      %cst_14 = arith.constant 0.000000e+00 : f32
      %16 = vector.broadcast %cst_14 : f32 to vector<8x128xf32>
      %17 = arith.maximumf %15, %16 : vector<8x128xf32>
      %c0_15 = arith.constant 0 : index
      %c0_16 = arith.constant 0 : index
      %18 = vector.load %arg6[%c0_15, %c0_16] : memref<8x128xf32, #tpu.memory_space<vmem>>, vector<8x128xf32>
      tpu.vector_store %arg6[%c0_15, %c0_16], %17 {strides = array<i32>} : memref<8x128xf32, #tpu.memory_space<vmem>>, vector<8x128xf32>,
    } else {
    }
    return
  }
  func.func @transform_0(%arg0: i32, %arg1: i32, %arg2: i32) -> (i32, i32) {
    %c0_i32 = arith.constant 0 : i32
    return %arg0, %arg2 : i32, i32
  }
  func.func @transform_1(%arg0: i32, %arg1: i32, %arg2: i32) -> (i32, i32) {
    %c0_i32 = arith.constant 0 : i32
    return %arg2, %arg1 : i32, i32
  }
  func.func @transform_2(%arg0: i32, %arg1: i32, %arg2: i32) -> (i32, i32) {
    %c0_i32 = arith.constant 0 : i32
    %c0_i32_0 = arith.constant 0 : i32
    return %c0_i32, %arg1 : i32, i32
  }
  func.func @transform_3(%arg0: i32, %arg1: i32, %arg2: i32) -> (i32, i32) {
    %c0_i32 = arith.constant 0 : i32
    return %arg0, %arg1 : i32, i32
  }
}

</mosaic_0001>

<bundles_post_ra>
// kernel: linear_relu.1
= control target key start
LH: loop header
LB: loop body
LE: loop exit
PB: predicated region body
PF: predicated region fallthrough
CT: control target
= control target key end

     0   :  { %v230_v1 = vmov 0.0   ;;  %vm231_vm0 = vmmov 0   ;;  %s295_s0 = inlined_call_operand.vmem [shape: bf16[8,128], index: 0, kind: input, shape index: {}]   ;;  %s296_s1 = inlined_call_operand.vmem [shape: bf16[128,128], index: 1, kind: input, shape index: {}]   ;;  %s297_s2 = inlined_call_operand.vmem [shape: f32[1,128], index: 2, kind: input, shape index: {}]   ;;  %s298_s3 = inlined_call_operand.hbm [shape: f32[8,128], index: 3, kind: output, shape index: {}]  }
   0x1   :  { %v198_v0 = vld [vmem:[%s296_s1] sm:$0xff]   ;;  %175 = vmatprep.subr.bf16.mxu0 %v230_v1  ;;  %v199_v2 = vld [vmem:[%s296_s1 + $0x8] sm:$0xff]   ;;  %191 = vmatprep.mubr.msk.bf16.mxu0 %vm231_vm0, %v230_v1  ;;  %v200_v3 = vld [vmem:[%s296_s1 + $0x10] sm:$0xff]  }
   0x2   :  { %176 = vmatpush3.bf16.msra.mxu0 %v198_v0 }
   0x3   :  { %177 = vmatprep.subr.bf16.mxu0 %v230_v1 }
   0x6   :  { %178 = vmatpush3.bf16.msra.mxu0 %v199_v2 }
   0x7   :  { %179 = vmatprep.subr.bf16.mxu0 %v230_v1 }
   0x8   :  { %8 = vsyncpa [#allocation4], 0  ;;  %v201_v4 = vld [vmem:[%s296_s1 + $0x18] sm:$0xff]   ;;  %v202_v5 = vld [vmem:[%s296_s1 + $0x20] sm:$0xff]   ;;  %s232_s5 = smov [#allocation3]  }
   0x9   :  { %v203_v6 = vld [vmem:[%s296_s1 + $0x28] sm:$0xff]   ;;  %v204_v7 = vld [vmem:[%s296_s1 + $0x30] sm:$0xff]   ;;  %v205_v8 = vld [vmem:[%s296_s1 + $0x38] sm:$0xff]   ;;  %s149_s6 = sshll.u32 %s232_s5, 4  ;;  %s150_s6 = int_to_ptr.vmem [resolvable:$true] %s149_s6 }
   0xa   :  { %180 = vmatpush3.bf16.msra.mxu0 %v200_v3  ;;  %v22_v9 = vld [vmem:[%s295_s0] sm:$0xf]  ;;  %s206_s1 = scalar_lea.vmem %s150_s6, 128  ;;  %p211_p1 = scmp.lt.s32.totalorder %s150_s6, %s150_s6 }
   0xb   :  { %181 = vmatprep.subr.bf16.mxu0 %v230_v1  ;;  %v165_v10 = vld [vmem:[%s297_s2] ss:$0 sm:$0xff]  ;;  %p207_p0 = scmp.ne.s32.totalorder %s150_s6, %s206_s1  ;;  %p212_p2 = scmp.lt.s32.totalorder %s206_s1, %s206_s1 }
   0xd   :  { %p213_p3 = por %p212_p2, %p211_p1 }
   0xe   :  { %182 = vmatpush3.bf16.msra.mxu0 %v201_v4 }
   0xf   :  { %183 = vmatprep.subr.bf16.mxu0 %v230_v1  ;;  %p214_p4 = pnand %p213_p3, %p207_p0 }
  0x12   :  { %184 = vmatpush3.bf16.msra.mxu0 %v202_v5 }
  0x13   :  { %185 = vmatprep.subr.bf16.mxu0 %v230_v1 }
  0x16   :  { %186 = vmatpush3.bf16.msra.mxu0 %v203_v6 }
  0x17   :  { %187 = vmatprep.subr.bf16.mxu0 %v230_v1 }
  0x1a   :  { %188 = vmatpush3.bf16.msra.mxu0 %v204_v7 }
  0x1b   :  { %189 = vmatprep.subr.bf16.mxu0 %v230_v1 }
  0x1e   :  { %190 = vmatpush3.bf16.msra.mxu0 %v205_v8 }
  0x21   :  { %192 = vmatmul.mubr.bf16.vlgmr.msra.gmra.mrb[0].mxu0 %v22_v9 }
  0xf4   :  { %v121_v11 = vpop.f32.mrb[0].mxu0 }
  0xf5   :  { %v140_v12 = vadd.f32 %v165_v10, %v121_v11  ;;  %v193_v13 = vpop.f32.mrb[1].mxu0 }
  0xf6   :  { %v124_v14 = vpop.f32.mrb[2].mxu0 }
  0xf7   :  { %v141_v15 = vmax.f32 %v140_v12, 0.0  ;;  %v194_v16 = vpop.f32.mrb[3].mxu0 }
  0xf9   :  { %142 = vst [vmem:[#allocation3] sm:$0xff] %v141_v15 }
  0xfa   :  { %217 = shalt.err (!%p214_p4)
}
  0xfb   :  { %s218_s2 = scalar_lea.hbm %s298_s3, 128 }
  0xfc   :  { %p219_p5 = scmp.ne.s32.totalorder %s298_s3, %s218_s2  ;;  %p222_p6 = scmp.lt.u32.totalorder %s218_s2, %s298_s3 }
  0xfe   :  { %p224_p7 = pnand %p222_p6, %p219_p5 }
 0x100   :  { %227 = shalt.err (!%p224_p7)
}
 0x101   :  { %152 = dma.vmem_to_hbm [thread:$0]  %s150_s6, 128, %s298_s3, [#allocation4]  }
 0x102   :  { %228 = dma.done.wait [#allocation4], 128  }
 0x103   :  { %229 = vsyncadd [#allocation4], 4294967168 }
 0x104   :  { %156 = vsyncpa [#allocation4], 1 }

</bundles_post_ra>
